<compile_context>
chip_gen: v5e
topology: v5e:2x2
jax: 0.10.0
libtpu: 0.0.40
codegen_flags: <defaults>
</compile_context>

<pallas_src>
import numpy as np

import jax
import jax.numpy as jnp
from jax import lax
from jax.experimental import pallas as pl
from jax.experimental.pallas import tpu as pltpu


# Table-in-VMEM threshold (bytes). Conservative across generations:
# v5e/v6e have 128 MiB VMEM, v7x only 64 MiB physical / 32 MiB default scoped,
# so 8 MiB (x2 for pipeline buffering) leaves ample headroom everywhere.
_VMEM_TABLE_BYTES_LIMIT = 8 * 1024 * 1024


def _attention_softmax_nll(E_raw, L_raw, onehot_f32, p_ref, loss_ref):
    """Shared math: cosine attention -> batch softmax -> class renorm -> NLL."""
    B, C = E_raw.shape

    # ---- L2 normalization (f32 on the VPU/EUP) ------------------------------
    e_n = E_raw * lax.rsqrt(jnp.sum(E_raw * E_raw, axis=-1, keepdims=True))
    le_n = L_raw * lax.rsqrt(jnp.sum(L_raw * L_raw, axis=-1, keepdims=True))

    # ---- cosine attention on the MXU ----------------------------------------
    # dot_res[i, j] = <e_n[i], le_n[j]> : contract the lane axis of BOTH
    # operands (no materialized transpose). Fold the 1/0.2 temperature into
    # the tiny (B, B) result instead of the full (B, C) tile.
    dot_res = lax.dot_general(
        e_n, le_n,
        dimension_numbers=(((1,), (1,)), ((), ())),
        preferred_element_type=jnp.float32) * jnp.float32(1.0 / 0.2)   # (B, B)
    el = lax.dot_general(
        dot_res, le_n,
        dimension_numbers=(((1,), (0,)), ((), ())),
        preferred_element_type=jnp.float32)                            # (B, C)

    # ---- log-softmax over the BATCH axis (torch.softmax(Elogit, 0)) ---------
    m0 = jnp.max(el, axis=0, keepdims=True)
    sh = el - m0
    log_e_x_y = sh - jnp.log(jnp.sum(jnp.exp(sh), axis=0, keepdims=True))

    # ---- class-axis renormalization, still in log space ---------------------
    m1 = jnp.max(log_e_x_y, axis=-1, keepdims=True)
    log_rowsum = m1 + jnp.log(
        jnp.sum(jnp.exp(log_e_x_y - m1), axis=-1, keepdims=True))
    logp = log_e_x_y - log_rowsum                                # log E_y_given_x
    p_ref[...] = jnp.exp(logp).astype(p_ref.dtype)

    # ---- NLLLoss(log P, target), reduction='mean' ----------------------------
    picked = jnp.sum(jnp.where(onehot_f32 > 0.5, logp, 0.0))     # sum_i log P[i, t_i]
    loss_ref[0, 0] = -picked / jnp.float32(B)


def eb_loss_kernel_vmem_table(tgt_col_ref,   # (B, 1) int32 targets in VMEM
                              elogit_ref,    # (B, C) student logits (native dtype)
                              embed_ref,     # (n_cls, C) full embedding table in VMEM
                              loss_ref,      # (1, 1) f32 SMEM output (scalar loss)
                              p_ref):        # (B, C) f32 VMEM output (E_y_given_x)
    B, C = elogit_ref.shape
    n_cls = embed_ref.shape[0]

    # One-hot built with a single vectorized compare; it is both the MXU
    # gather operand and (n_cls == C for this module) the NLL pick mask.
    tgt_col = tgt_col_ref[...]                                       # (B, 1)
    cls_ids = lax.broadcasted_iota(jnp.int32, (B, n_cls), 1)
    onehot = (cls_ids == tgt_col).astype(jnp.float32)                # (B, n_cls)

    # Embedding gather as one-hot @ table on the MXU (no per-row DMAs).
    table = embed_ref[...].astype(jnp.float32)
    L_raw = lax.dot_general(
        onehot, table,
        dimension_numbers=(((1,), (0,)), ((), ())),
        preferred_element_type=jnp.float32)                          # (B, C)

    E_raw = elogit_ref[...].astype(jnp.float32)
    _attention_softmax_nll(E_raw, L_raw, onehot, p_ref, loss_ref)


def eb_loss_kernel_hbm_gather(tgt_smem,      # (B,) int32 targets in SMEM (prefetch)
                              tgt_col_ref,   # (B, 1) int32 targets in VMEM
                              elogit_ref,    # (B, C) student logits (native dtype)
                              embed_hbm,     # (n_cls, C) table left in HBM
                              loss_ref,      # (1, 1) f32 SMEM output
                              p_ref,         # (B, C) f32 VMEM output
                              lemb_vmem,     # (B, C) VMEM scratch (gathered rows)
                              row_sem):      # (1,) shared DMA semaphore
    B, C = elogit_ref.shape
    n_cls = embed_hbm.shape[0]

    # All SMEM scalar reads happen once, up front (no slds after the waits).
    # Clamp the DMA source index so a bad label cannot fault the DMA engine.
    tgt_idx = [jnp.clip(tgt_smem[i], 0, n_cls - 1) for i in range(B)]

    # Issue all B row DMAs on ONE shared semaphore, then (later) wait on all.
    copies = []
    for i in range(B):
        cp = pltpu.make_async_copy(
            embed_hbm.at[pl.ds(tgt_idx[i], 1), :],
            lemb_vmem.at[pl.ds(i, 1), :],
            row_sem.at[0],
        )
        cp.start()
        copies.append(cp)

    # Overlap: vectorized NLL mask + logit upcast/normalization prep while the
    # rows stream in (pure VPU work, no scalar loads).
    tgt_col = tgt_col_ref[...]                                       # (B, 1)
    cls_ids = lax.broadcasted_iota(jnp.int32, (B, C), 1)
    onehot = (cls_ids == tgt_col).astype(jnp.float32)                # (B, C)
    E_raw = elogit_ref[...].astype(jnp.float32)

    # Back-to-back waits on the single shared semaphore.
    for cp in copies:
        cp.wait()
    L_raw = lemb_vmem[...].astype(jnp.float32)

    _attention_softmax_nll(E_raw, L_raw, onehot, p_ref, loss_ref)


def eb_loss_forward(elogit, embed_weight, target, *, force_hbm_gather=False):
    """Pallas implementation of EBLoss.forward.

    Args:
      elogit:       (B, n_cls) float logits (native dtype, e.g. f32/bf16).
      embed_weight: (n_cls, n_cls) float embedding table (native dtype).
      target:       (B,) int class labels.
      force_hbm_gather: force the HBM row-gather fallback (for testing).
    Returns:
      (loss_scalar, E_y_given_x) matching the PyTorch module.
    """
    B, C = elogit.shape
    n_cls = embed_weight.shape[0]
    assert embed_weight.shape == (n_cls, C) and n_cls == C
    # TODO(synk): if C is ever not a multiple of 128, pad the class axis (and
    #             mask the padded lanes before the class-axis sums/softmax).

    tgt_i32 = target.astype(jnp.int32)
    tgt_col = tgt_i32.reshape(B, 1)

    table_bytes = n_cls * C * embed_weight.dtype.itemsize
    use_vmem_table = (not force_hbm_gather) and table_bytes <= _VMEM_TABLE_BYTES_LIMIT

    out_shape = (
        jax.ShapeDtypeStruct((1, 1), jnp.float32),
        jax.ShapeDtypeStruct((B, C), jnp.float32),
    )
    compiler_params = pltpu.CompilerParams(dimension_semantics=("arbitrary",))
    # TODO(synk): with grid=(1,) the second TensorCore on v7x idles; batch
    #             several independent loss computations into one call (extra
    #             "parallel" grid axis) if this op is ever hot.

    if use_vmem_table:
        grid_spec = pltpu.PrefetchScalarGridSpec(
            num_scalar_prefetch=0,
            grid=(1,),
            in_specs=[
                pl.BlockSpec((B, 1), lambda i: (0, 0)),       # target column -> VMEM
                pl.BlockSpec((B, C), lambda i: (0, 0)),       # Elogit -> VMEM
                pl.BlockSpec((n_cls, C), lambda i: (0, 0)),   # full table -> VMEM
            ],
            out_specs=(
                pl.BlockSpec(memory_space=pltpu.MemorySpace.SMEM),  # scalar loss
                pl.BlockSpec((B, C), lambda i: (0, 0)),             # E_y_given_x
            ),
        )
        loss, p = pl.pallas_call(
            eb_loss_kernel_vmem_table,
            out_shape=out_shape,
            grid_spec=grid_spec,
            compiler_params=compiler_params,
        )(tgt_col, elogit, embed_weight)
    else:
        grid_spec = pltpu.PrefetchScalarGridSpec(
            num_scalar_prefetch=1,                       # target -> SMEM (drives DMAs)
            grid=(1,),
            in_specs=[
                pl.BlockSpec((B, 1), lambda i, tgt: (0, 0)),   # target column -> VMEM
                pl.BlockSpec((B, C), lambda i, tgt: (0, 0)),   # Elogit -> VMEM
                pl.BlockSpec(memory_space=pl.ANY),             # table stays in HBM
            ],
            out_specs=(
                pl.BlockSpec(memory_space=pltpu.MemorySpace.SMEM),
                pl.BlockSpec((B, C), lambda i, tgt: (0, 0)),
            ),
            scratch_shapes=[
                pltpu.VMEM((B, C), embed_weight.dtype),   # gathered rows (native dtype)
                pltpu.SemaphoreType.DMA((1,)),            # ONE shared DMA semaphore
            ],
        )
        loss, p = pl.pallas_call(
            eb_loss_kernel_hbm_gather,
            out_shape=out_shape,
            grid_spec=grid_spec,
            compiler_params=compiler_params,
        )(tgt_i32, tgt_col, elogit, embed_weight)

    return loss[0, 0], p


if __name__ == "__main__":
    key = jax.random.PRNGKey(0)
    k_emb, k_logit, k_tgt = jax.random.split(key, 3)

    B = 8          # batch
    n_cls = 128    # number of classes (lane-dense)

    # nn.Embedding(n_cls, n_cls) default init: N(0, 1)
    embed_weight = jax.random.normal(k_emb, (n_cls, n_cls), dtype=jnp.float32)
    elogit = jax.random.normal(k_logit, (B, n_cls), dtype=jnp.float32)
    target = jax.random.randint(k_tgt, (B,), 0, n_cls, dtype=jnp.int32)

    # Float64 numpy reference of the same semantics (precision-independent).
    emb64 = np.asarray(embed_weight, dtype=np.float64)
    el64 = np.asarray(elogit, dtype=np.float64)
    tgt_np = np.asarray(target)
    le = emb64[tgt_np]
    le_n = le / np.linalg.norm(le, axis=-1, keepdims=True)
    e_n = el64 / np.linalg.norm(el64, axis=-1, keepdims=True)
    el_att = (e_n @ le_n.T @ le_n) / 0.2
    ex = np.exp(el_att - el_att.max(axis=0, keepdims=True))
    sm = ex / ex.sum(axis=0, keepdims=True)                 # softmax over batch axis
    p_ref = sm / sm.sum(axis=-1, keepdims=True)             # class-axis renorm
    loss_ref = -np.mean(np.log(p_ref)[np.arange(B), tgt_np])

    # Default path: full table in VMEM, one-hot MXU gather.
    loss_a, p_a = eb_loss_forward(elogit, embed_weight, target)
    # Fallback path: HBM row gather with a single shared DMA semaphore.
    loss_b, p_b = eb_loss_forward(elogit, embed_weight, target,
                                  force_hbm_gather=True)
    jax.block_until_ready((loss_a, p_a, loss_b, p_b))

    for loss, p in ((loss_a, p_a), (loss_b, p_b)):
        assert np.allclose(np.asarray(p, dtype=np.float64), p_ref,
                           atol=1e-5, rtol=2e-2), \
            float(np.max(np.abs(np.asarray(p) - p_ref)))
        assert np.allclose(float(loss), loss_ref, atol=1e-2, rtol=1e-2), \
            (float(loss), float(loss_ref))

    print("KERNEL_OK")
</pallas_src>

<mosaic_0001>
module attributes {stable_mosaic.version = 11 : i64} {
  func.func @eb_loss_kernel_vmem_table(%arg0: i32, %arg1: memref<8x1xi32, #tpu.memory_space<vmem>>, %arg2: memref<8x128xf32, #tpu.memory_space<vmem>>, %arg3: memref<128x128xf32, #tpu.memory_space<vmem>>, %arg4: memref<1x1xf32, #tpu.memory_space<smem>>, %arg5: memref<8x128xf32, #tpu.memory_space<vmem>>) attributes {dimension_semantics = [#tpu.dimension_semantics<arbitrary>], iteration_bounds = array<i64: 1>, scalar_prefetch = 0 : i64, scratch_operands = 0 : i64, tpu.core_type = #tpu.core_type<tc>, window_params = [{pipeline_mode = #tpu.pipeline_mode<synchronous>, transform_indices = @transform_0, window_bounds = array<i64: 8, 1>}, {pipeline_mode = #tpu.pipeline_mode<synchronous>, transform_indices = @transform_1, window_bounds = array<i64: 8, 128>}, {pipeline_mode = #tpu.pipeline_mode<synchronous>, transform_indices = @transform_2, window_bounds = array<i64: 128, 128>}, {transform_indices = @transform_3, window_bounds = array<i64: 1, 1>}, {pipeline_mode = #tpu.pipeline_mode<synchronous>, transform_indices = @transform_4, window_bounds = array<i64: 8, 128>}]} {
    %c0 = arith.constant 0 : index
    %c0_0 = arith.constant 0 : index
    %0 = vector.load %arg1[%c0, %c0_0] : memref<8x1xi32, #tpu.memory_space<vmem>>, vector<8x1xi32>
    %1 = tpu.iota {dimensions = array<i32: 1>} : vector<8x128xi32>
    %2 = vector.broadcast %0 : vector<8x1xi32> to vector<8x128xi32>
    %3 = arith.cmpi eq, %1, %2 : vector<8x128xi32>
    %4 = arith.extui %3 : vector<8x128xi1> to vector<8x128xi32>
    %5 = arith.sitofp %4 : vector<8x128xi32> to vector<8x128xf32>
    %c0_1 = arith.constant 0 : index
    %c0_2 = arith.constant 0 : index
    %6 = vector.load %arg3[%c0_1, %c0_2] : memref<128x128xf32, #tpu.memory_space<vmem>>, vector<128x128xf32>
    %cst = arith.constant dense<0.000000e+00> : vector<8x128xf32>
    %7 = tpu.matmul %5, %6, %cst {dimension_numbers = #tpu.dot_dimension_numbers<[1], [0], [0], [1], [0, 0, 1, 1], [], []>} : vector<8x128xf32>, vector<128x128xf32>, vector<8x128xf32> -> vector<8x128xf32>
    %c0_3 = arith.constant 0 : index
    %c0_4 = arith.constant 0 : index
    %8 = vector.load %arg2[%c0_3, %c0_4] : memref<8x128xf32, #tpu.memory_space<vmem>>, vector<8x128xf32>
    %9 = arith.mulf %8, %8 : vector<8x128xf32>
    %cst_5 = arith.constant dense<0.000000e+00> : vector<8xf32>
    %10 = vector.multi_reduction <add>, %9, %cst_5 [1] : vector<8x128xf32> to vector<8xf32>
    %11 = vector.shape_cast %10 : vector<8xf32> to vector<8x1xf32>
    %12 = math.rsqrt %11 : vector<8x1xf32>
    %13 = vector.broadcast %12 : vector<8x1xf32> to vector<8x128xf32>
    %14 = arith.mulf %8, %13 : vector<8x128xf32>
    %15 = arith.mulf %7, %7 : vector<8x128xf32>
    %cst_6 = arith.constant dense<0.000000e+00> : vector<8xf32>
    %16 = vector.multi_reduction <add>, %15, %cst_6 [1] : vector<8x128xf32> to vector<8xf32>
    %17 = vector.shape_cast %16 : vector<8xf32> to vector<8x1xf32>
    %18 = math.rsqrt %17 : vector<8x1xf32>
    %19 = vector.broadcast %18 : vector<8x1xf32> to vector<8x128xf32>
    %20 = arith.mulf %7, %19 : vector<8x128xf32>
    %cst_7 = arith.constant dense<0.000000e+00> : vector<8x8xf32>
    %21 = tpu.matmul %14, %20, %cst_7 {dimension_numbers = #tpu.dot_dimension_numbers<[1], [1], [0], [0], [0, 0, 1, 0], [], []>} : vector<8x128xf32>, vector<8x128xf32>, vector<8x8xf32> -> vector<8x8xf32>
    %cst_8 = arith.constant 5.000000e+00 : f32
    %22 = vector.broadcast %cst_8 : f32 to vector<8x8xf32>
    %23 = arith.mulf %21, %22 : vector<8x8xf32>
    %cst_9 = arith.constant dense<0.000000e+00> : vector<8x128xf32>
    %24 = tpu.matmul %23, %20, %cst_9 {dimension_numbers = #tpu.dot_dimension_numbers<[1], [0], [0], [1], [0, 0, 1, 1], [], []>} : vector<8x8xf32>, vector<8x128xf32>, vector<8x128xf32> -> vector<8x128xf32>
    %cst_10 = arith.constant dense<0xFF800000> : vector<128xf32>
    %25 = vector.multi_reduction <maximumf>, %24, %cst_10 [0] : vector<8x128xf32> to vector<128xf32>
    %26 = vector.shape_cast %25 : vector<128xf32> to vector<1x128xf32>
    %27 = vector.broadcast %26 : vector<1x128xf32> to vector<8x128xf32>
    %28 = arith.subf %24, %27 : vector<8x128xf32>
    %29 = math.exp %28 : vector<8x128xf32>
    %cst_11 = arith.constant dense<0.000000e+00> : vector<128xf32>
    %30 = vector.multi_reduction <add>, %29, %cst_11 [0] : vector<8x128xf32> to vector<128xf32>
    %31 = vector.shape_cast %30 : vector<128xf32> to vector<1x128xf32>
    %32 = math.log %31 : vector<1x128xf32>
    %33 = vector.broadcast %32 : vector<1x128xf32> to vector<8x128xf32>
    %34 = arith.subf %28, %33 : vector<8x128xf32>
    %cst_12 = arith.constant dense<0xFF800000> : vector<8xf32>
    %35 = vector.multi_reduction <maximumf>, %34, %cst_12 [1] : vector<8x128xf32> to vector<8xf32>
    %36 = vector.shape_cast %35 : vector<8xf32> to vector<8x1xf32>
    %37 = vector.broadcast %36 : vector<8x1xf32> to vector<8x128xf32>
    %38 = arith.subf %34, %37 : vector<8x128xf32>
    %39 = math.exp %38 : vector<8x128xf32>
    %cst_13 = arith.constant dense<0.000000e+00> : vector<8xf32>
    %40 = vector.multi_reduction <add>, %39, %cst_13 [1] : vector<8x128xf32> to vector<8xf32>
    %41 = vector.shape_cast %40 : vector<8xf32> to vector<8x1xf32>
    %42 = math.log %41 : vector<8x1xf32>
    %43 = arith.addf %36, %42 : vector<8x1xf32>
    %44 = vector.broadcast %43 : vector<8x1xf32> to vector<8x128xf32>
    %45 = arith.subf %34, %44 : vector<8x128xf32>
    %46 = math.exp %45 : vector<8x128xf32>
    %c0_14 = arith.constant 0 : index
    %c0_15 = arith.constant 0 : index
    %47 = vector.load %arg5[%c0_14, %c0_15] : memref<8x128xf32, #tpu.memory_space<vmem>>, vector<8x128xf32>
    tpu.vector_store %arg5[%c0_14, %c0_15], %46 {strides = array<i32>} : memref<8x128xf32, #tpu.memory_space<vmem>>, vector<8x128xf32>,
    %cst_16 = arith.constant 5.000000e-01 : f32
    %48 = vector.broadcast %cst_16 : f32 to vector<8x128xf32>
    %49 = arith.cmpf ogt, %5, %48 : vector<8x128xf32>
    %cst_17 = arith.constant 0.000000e+00 : f32
    %50 = vector.broadcast %cst_17 : f32 to vector<8x128xf32>
    %51 = arith.select %49, %45, %50 : vector<8x128xi1>, vector<8x128xf32>
    %52 = vector.shape_cast %51 : vector<8x128xf32> to vector<1x8x128xf32>
    %cst_18 = arith.constant dense<0.000000e+00> : vector<1xf32>
    %53 = vector.multi_reduction <add>, %52, %cst_18 [1, 2] : vector<1x8x128xf32> to vector<1xf32>
    %54 = vector.shape_cast %53 : vector<1xf32> to vector<1x1x1xf32>
    %55 = vector.extract %54[0, 0, 0] : f32 from vector<1x1x1xf32>
    %cst_19 = arith.constant 0.000000e+00 : f32
    %56 = arith.subf %cst_19, %55 : f32
    %cst_20 = arith.constant 8.000000e+00 : f32
    %57 = arith.divf %56, %cst_20 : f32
    %c0_21 = arith.constant 0 : index
    %c0_22 = arith.constant 0 : index
    %58 = memref.load %arg4[%c0_21, %c0_22] : memref<1x1xf32, #tpu.memory_space<smem>>
    memref.store %57, %arg4[%c0_21, %c0_22] : memref<1x1xf32, #tpu.memory_space<smem>>
    return
  }
  func.func @transform_0(%arg0: i32) -> (i32, i32) {
    %c0_i32 = arith.constant 0 : i32
    %c0_i32_0 = arith.constant 0 : i32
    %c0_i32_1 = arith.constant 0 : i32
    return %c0_i32, %c0_i32_0 : i32, i32
  }
  func.func @transform_1(%arg0: i32) -> (i32, i32) {
    %c0_i32 = arith.constant 0 : i32
    %c0_i32_0 = arith.constant 0 : i32
    %c0_i32_1 = arith.constant 0 : i32
    return %c0_i32, %c0_i32_0 : i32, i32
  }
  func.func @transform_2(%arg0: i32) -> (i32, i32) {
    %c0_i32 = arith.constant 0 : i32
    %c0_i32_0 = arith.constant 0 : i32
    %c0_i32_1 = arith.constant 0 : i32
    return %c0_i32, %c0_i32_0 : i32, i32
  }
  func.func @transform_3(%arg0: i32) -> (i32, i32) {
    %c0_i32 = arith.constant 0 : i32
    %c0_i32_0 = arith.constant 0 : i32
    %c0_i32_1 = arith.constant 0 : i32
    return %c0_i32, %c0_i32_0 : i32, i32
  }
  func.func @transform_4(%arg0: i32) -> (i32, i32) {
    %c0_i32 = arith.constant 0 : i32
    %c0_i32_0 = arith.constant 0 : i32
    %c0_i32_1 = arith.constant 0 : i32
    return %c0_i32, %c0_i32_0 : i32, i32
  }
}

</mosaic_0001>

<bundles_post_ra>
// kernel: tpu_custom_call.1
= control target key start
LH: loop header
LB: loop body
LE: loop exit
PB: predicated region body
PF: predicated region fallthrough
CT: control target
= control target key end

     0   :  { %10 = vsyncpa [#allocation3], 0  ;;  %s400_s0 = inlined_call_operand.vmem [shape: s32[8,1], index: 0, kind: input, shape index: {}]   ;;  %s401_s1 = inlined_call_operand.vmem [shape: f32[8,128], index: 1, kind: input, shape index: {}]   ;;  %s402_s2 = inlined_call_operand.hbm [shape: f32[128,128], index: 2, kind: input, shape index: {}]   ;;  %s403_s3 = inlined_call_operand.hbm [shape: f32[1,1], index: 3, kind: output, shape index: {0}]   ;;  %s404_s4 = inlined_call_operand.hbm [shape: f32[8,128], index: 4, kind: output, shape index: {1}]  }
   0x1   :  { %11 = vsyncpa [#allocation5], 0 }
   0x2   :  { %12 = vsyncpa [#allocation4], 0  ;;  %s21_s17 = sshll.u32 %s402_s2, 4  ;;  %s339_s18 = smov [#allocation2]   ;;  %s22_s17 = int_to_ptr.hbm [resolvable:$true] %s21_s17 }
   0x3   :  { %s23_s19 = sshll.u32 %s339_s18, 4  ;;  %s340_s20 = smov 128   ;;  %s24_s19 = int_to_ptr.vmem [resolvable:$true] %s23_s19 }
   0x4   :  { %s341_s21 = smov 8  }
   0x5   :  { %29 = dma.hbm_to_vmem [thread:$0]  %s22_s17, 2048, %s24_s19, [#allocation3], %s340_s20, %s340_s20, %s341_s21  }
   0x6   :  { %333 = dma.done.wait [#allocation3], 2048  }
   0x7   :  { %334 = vsyncadd [#allocation3], 4294965248  ;;  %v342_v0 = vmov 0   ;;  %v34_v1 = vld [vmem:[%s400_s0] sm:$0xff]  ;;  %v58_v2 = vld [vmem:[#allocation2 + $0x78] sm:$0xff]  ;;  %v35_v20 = vlaneseq  ;;  %v343_v23 = vmov 1.0  }
   0x8   :  { %256 = vset.pattern.permute.xlu0 %v342_v0  ;;  %v57_v3 = vld [vmem:[#allocation2 + $0x70] sm:$0xff]  ;;  %59 = vmatpush.msra.mxu0 %v58_v2  ;;  %v56_v4 = vld [vmem:[#allocation2 + $0x68] sm:$0xff]  ;;  %v55_v5 = vld [vmem:[#allocation2 + $0x60] sm:$0xff]  ;;  %vm129_vm7 = vcmask 64512   ;;  %s224_s27 = sshll.u32 %s404_s4, 4  ;;  %s213_s29 = sshll.u32 %s403_s3, 4  ;;  %s225_s27 = int_to_ptr.hbm [resolvable:$true] %s224_s27  ;;  %s214_s29 = int_to_ptr.hbm [resolvable:$true] %s213_s29 }
   0x9   :  { %38 = vperm.xlu0 %256, %v34_v1   ;;  %v54_v6 = vld [vmem:[#allocation2 + $0x58] sm:$0xff]  ;;  %v53_v7 = vld [vmem:[#allocation2 + $0x50] sm:$0xff]  ;;  %v52_v8 = vld [vmem:[#allocation2 + $0x48] sm:$0xff]  ;;  %v382_v21 = vand.u32 127, %v35_v20  ;;  %s347_s8 = smov [#allocation6]  }
   0xa   :  { %60 = vmatpush.msra.mxu0 %v57_v3  ;;  %v51_v9 = vld [vmem:[#allocation2 + $0x40] sm:$0xff]  ;;  %v50_v10 = vld [vmem:[#allocation2 + $0x38] sm:$0xff]  ;;  %v49_v11 = vld [vmem:[#allocation2 + $0x30] sm:$0xff] }
   0xb   :  { %v48_v12 = vld [vmem:[#allocation2 + $0x28] sm:$0xff]  ;;  %v47_v13 = vld [vmem:[#allocation2 + $0x20] sm:$0xff]  ;;  %v46_v14 = vld [vmem:[#allocation2 + $0x18] sm:$0xff] }
   0xc   :  { %61 = vmatpush.msra.mxu0 %v56_v4  ;;  %v45_v15 = vld [vmem:[#allocation2 + $0x10] sm:$0xff]  ;;  %v44_v16 = vld [vmem:[#allocation2 + $0x8] sm:$0xff]  ;;  %v43_v17 = vld [vmem:[#allocation2] sm:$0xff] }
   0xd   :  { %v79_v18 = vld [vmem:[%s401_s1] sm:$0xff]  ;;  %s345_s1 = smov [#allocation7]  }
   0xe   :  { %62 = vmatpush.msra.mxu0 %v55_v5  ;;  %v80_v19 = vmul.f32 %v79_v18, %v79_v18  ;;  %s222_s24 = sshll.u32 %s345_s1, 4  ;;  %s223_s24 = int_to_ptr.vmem [resolvable:$true] %s222_s24 }
  0x10   :  { %63 = vmatpush.msra.mxu0 %v54_v6  ;;  %81 = vadd.xlane.f32.xlu1 %v80_v19 }
  0x12   :  { %64 = vmatpush.msra.mxu0 %v53_v7 }
  0x14   :  { %65 = vmatpush.msra.mxu0 %v52_v8  ;;  %v344_v8 = vmov 0.0  }
  0x16   :  { %66 = vmatpush.msra.mxu0 %v51_v9 }
  0x18   :  { %67 = vmatpush.msra.mxu0 %v50_v10 }
  0x1a   :  { %68 = vmatpush.msra.mxu0 %v49_v11 }
  0x1c   :  { %69 = vmatpush.msra.mxu0 %v48_v12 }
  0x1e   :  { %70 = vmatpush.msra.mxu0 %v47_v13 }
  0x20   :  { %71 = vmatpush.msra.mxu0 %v46_v14 }
  0x22   :  { %72 = vmatpush.msra.mxu0 %v45_v15  ;;  %v346_v15 = vmov 8.0  }
  0x24   :  { %73 = vmatpush.msra.mxu0 %v44_v16 }
  0x26   :  { %74 = vmatpush.msra.mxu0 %v43_v17 }
  0x7b   :  { %v384_v22 = vpop.permute.xlu0 %38 }
  0x7c   :  { %vm40_vm0 = vcmp.eq.s32.totalorder %v382_v21, %v384_v22 }
  0x7d   :  { %241 = vmatmul.msk.f32.vlgmr.msra.gmra.mxu0 %vm40_vm0, %v343_v23  ;;  %v240_v9 = vsel %vm40_vm0, 1.0, %v344_v8 }
  0x7e   :  { %vm185_vm8 = vcmp.gt.f32.partialorder %v240_v9, 0.5 }
  0x83   :  { %v82_v26 = vpop.xlane.xlu1 %81 }
  0x84   :  { %257 = vrsqrt.f32 %v82_v26  ;;  %vm89_vm1 = vweird.f32 %v82_v26 }
  0x8a   :  { %v258_v27 = vpop.eup %257 }
  0x8b   :  { %v84_v28 = vmul.f32 %v258_v27, %v82_v26  ;;  %vm90_vm2 = vweird.f32 %v258_v27 }
  0x8c   :  { %vm91_vm4 = vmor %vm89_vm1, %vm90_vm2 }
  0x8d   :  { %v85_v30 = vmul.f32 %v258_v27, %v84_v28 }
  0x8f   :  { %v86_v32 = vmul.f32 0.5, %v85_v30 }
  0x91   :  { %v87_v35 = vsub.f32 1.5, %v86_v32 }
  0x93   :  { %v88_v38 = vmul.f32 %v258_v27, %v87_v35 }
  0x95   :  { %v92_v42 = vsel %vm91_vm4, %v258_v27, %v88_v38 }
  0x96   :  { %v93_v43 = vmul.f32 %v92_v42, %v79_v18 }
  0xfa   :  { %v76_v24 = vpop.f32.mrf.mxu0 }
  0xfb   :  { %v94_v25 = vmul.f32 %v76_v24, %v76_v24 }
  0xfd   :  { %95 = vadd.xlane.f32.xlu0 %v94_v25 }
 0x170   :  { %v96_v29 = vpop.xlane.xlu0 %95 }
 0x171   :  { %259 = vrsqrt.f32 %v96_v29  ;;  %vm103_vm5 = vweird.f32 %v96_v29 }
 0x177   :  { %v260_v31 = vpop.eup %259 }
 0x178   :  { %v98_v33 = vmul.f32 %v260_v31, %v96_v29  ;;  %vm104_vm3 = vweird.f32 %v260_v31 }
 0x179   :  { %vm105_vm6 = vmor %vm103_vm5, %vm104_vm3 }
 0x17a   :  { %v99_v34 = vmul.f32 %v260_v31, %v98_v33 }
 0x17c   :  { %v100_v36 = vmul.f32 0.5, %v99_v34 }
 0x17e   :  { %v101_v37 = vsub.f32 1.5, %v100_v36 }
 0x180   :  { %v102_v39 = vmul.f32 %v260_v31, %v101_v37 }
 0x182   :  { %v106_v40 = vsel %vm105_vm6, %v260_v31, %v102_v39 }
 0x183   :  { %v107_v41 = vmul.f32 %v106_v40, %v76_v24 }
 0x185   :  { %123 = vmatpush.xpose.msra.mxu1 %v107_v41  ;;  %148 = vmatpush.msra.mxu2 %v107_v41 }
 0x188   :  { %124 = vmatmul.f32.vlgmr.msra.gmra.mxu1 %v93_v43 }
 0x205   :  { %v125_v44 = vpop.f32.mrf.mxu1 }
 0x206   :  { %v128_v45 = vmul.f32 5.0, %v125_v44 }
 0x208   :  { %242 = vmatmul.msk.f32.vlgmr.msra.gmra.mxu2 %vm129_vm7, %v128_v45 }
 0x28b   :  { %v150_v46 = vpop.f32.mrf.mxu2 }
 0x28c   :  { %v153_v47 = vrot.slane %v150_v46, 4 }
 0x28e   :  { %v154_v48 = vmax.f32 %v150_v46, %v153_v47 }
 0x290   :  { %v155_v49 = vrot.slane %v154_v48, 2 }
 0x292   :  { %v156_v50 = vmax.f32 %v154_v48, %v155_v49 }
 0x294   :  { %v157_v51 = vrot.slane %v156_v50, 1 }
 0x296   :  { %v158_v52 = vmax.f32 %v156_v50, %v157_v51 }
 0x298   :  { %v159_v53 = vsub.f32 %v150_v46, %v158_v52 }
 0x29a   :  { %v160_v54 = vmul.f32 1.442695, %v159_v53 }
 0x29c   :  { %261 = vpow2.f32 %v160_v54 }
 0x2a2   :  { %v262_v55 = vpop.eup %261 }
 0x2a3   :  { %v162_v56 = vrot.slane %v262_v55, 4 }
 0x2a5   :  { %v163_v57 = vadd.f32 %v262_v55, %v162_v56 }
 0x2a7   :  { %v164_v58 = vrot.slane %v163_v57, 2 }
 0x2a9   :  { %v165_v59 = vadd.f32 %v164_v58, %v163_v57 }
 0x2ab   :  { %v166_v60 = vrot.slane %v165_v59, 1 }
 0x2ad   :  { %v167_v61 = vadd.f32 %v166_v60, %v165_v59 }
 0x2af   :  { %263 = vlog2.f32 %v167_v61 }
 0x2b5   :  { %v264_v62 = vpop.eup %263 }
 0x2b6   :  { %v169_v63 = vmul.f32 0.6931472, %v264_v62 }
 0x2b8   :  { %v170_v0 = vsub.f32 %v159_v53, %v169_v63 }
 0x2ba   :  { %171 = vmax.xlane.f32.xlu1 %v170_v0 }
 0x32d   :  { %v172_v1 = vpop.xlane.xlu1 %171 }
 0x32e   :  { %v173_v2 = vsub.f32 %v170_v0, %v172_v1 }
 0x330   :  { %v174_v3 = vmul.f32 1.442695, %v173_v2 }
 0x332   :  { %265 = vpow2.f32 %v174_v3 }
 0x338   :  { %v266_v4 = vpop.eup %265 }
 0x339   :  { %176 = vadd.xlane.f32.xlu2 %v266_v4 }
 0x3ac   :  { %v177_v5 = vpop.xlane.xlu2 %176 }
 0x3ad   :  { %267 = vlog2.f32 %v177_v5 }
 0x3b3   :  { %v268_v6 = vpop.eup %267 }
 0x3b4   :  { %v179_v7 = vmul.f32 0.6931472, %v268_v6 }
 0x3b6   :  { %v180_v10 = vadd.f32 %v179_v7, %v172_v1 }
 0x3b8   :  { %v181_v11 = vsub.f32 %v170_v0, %v180_v10 }
 0x3ba   :  { %v182_v12 = vmul.f32 1.442695, %v181_v11  ;;  %v186_v13 = vsel %vm185_vm8, %v181_v11, 0.0 }
 0x3bb   :  { %187 = vadd.xlane.f32.xlu2 %v186_v13 }
 0x3bc   :  { %269 = vpow2.f32 %v182_v12 }
 0x3bd   :  { %271 = vrcp.f32 %v346_v15 }
 0x3c2   :  { %v270_v14 = vpop.eup %269 }
 0x3c3   :  { %184 = vst [vmem:[#allocation7] sm:$0xff] %v270_v14  ;;  %v272_v16 = vpop.eup %271 }
 0x3c4   :  { %227 = dma.vmem_to_hbm [thread:$0]  %s223_s24, 128, %s225_s27, [#allocation4]   ;;  %v198_v17 = vmul.f32 8.0, %v272_v16  ;;  %vm202_vm9 = vweird.f32 %v272_v16 }
 0x3c6   :  { %v199_v18 = vsub.f32 1.0, %v198_v17 }
 0x3c8   :  { %v200_v22 = vmul.f32 %v272_v16, %v199_v18 }
 0x3ca   :  { %v201_v25 = vadd.f32 %v272_v16, %v200_v22 }
 0x3cc   :  { %v203_v28 = vsel %vm202_vm9, %v272_v16, %v201_v25 }
 0x42e   :  { %v188_v19 = vpop.xlane.xlu2 %187 }
 0x42f   :  { %v189_v20 = vrot.slane %v188_v19, 4 }
 0x431   :  { %v190_v21 = vadd.f32 %v189_v20, %v188_v19 }
 0x433   :  { %v191_v23 = vrot.slane %v190_v21, 2 }
 0x435   :  { %v192_v24 = vadd.f32 %v191_v23, %v190_v21 }
 0x437   :  { %v193_v26 = vrot.slane %v192_v24, 1 }
 0x439   :  { %v194_v27 = vadd.f32 %v193_v26, %v192_v24 }
 0x43b   :  { %243 = vpush %v194_v27 }
 0x43c   :  { %245 = vpush %v203_v28 }
 0x46c   :  { %s244_s30 = spop %243 }
 0x46d   :  { %s196_s5 = ssub.f32 0.0, %s244_s30  ;;  %s246_s6 = spop %245 }
 0x46f   :  { %s205_s7 = smul.f32 %s246_s6, %s196_s5 }
 0x471   :  { %207 = sst [smem:[#allocation6]] %s205_s7 }
 0x472   :  { %216 = dma.smem_to_hbm %s347_s8, 16, %s214_s29, [#allocation5]  }
 0x473   :  { %335 = dma.done.wait [#allocation5], 16  }
 0x474   :  { %336 = vsyncadd [#allocation5], 4294967280 }
 0x475   :  { %337 = dma.done.wait [#allocation4], 128  }
 0x476   :  { %338 = vsyncadd [#allocation4], 4294967168 }
 0x477   :  { %236 = sfence }
 0x478   :  { %237 = vsyncpa [#allocation3], 1 }
 0x479   :  { %238 = vsyncpa [#allocation4], 1 }
 0x47a   :  { %239 = vsyncpa [#allocation5], 1 }

</bundles_post_ra>
